<compile_context>
chip_gen: v5e
topology: v5e:2x2
jax: 0.10.0
libtpu: 0.0.40
codegen_flags: <defaults>
</compile_context>

<pallas_src>
import jax
import jax.numpy as jnp
from jax.experimental import pallas as pl
from jax.experimental.pallas import tpu as pltpu


def _patch_embed_kernel(p_ref, w_ref, b_ref, o_ref):
    # p_ref: (1, TM, GK)  patch rows for this M tile (G groups packed on K axis)
    # w_ref: (1, GK, GE)  block-diagonal weight (VMEM-resident across M tiles)
    # b_ref: (1, 1,  GE)  packed bias (f32)
    # o_ref: (1, TM, GE)
    acc = jnp.dot(p_ref[0], w_ref[0], preferred_element_type=jnp.float32)
    o_ref[0] = (acc + b_ref[0]).astype(o_ref.dtype)


def _hw_params():
    """Generation-aware knobs: (lane_pack_cap, gk_cap, max_weight_bytes, vmem_cap)."""
    vmem_phys = 128 << 20
    try:
        info = pltpu.get_tpu_info()
        vmem_phys = int(getattr(info, "vmem_capacity_bytes", vmem_phys))
    except Exception:
        pass
    wide_mxu = False
    try:
        kind = jax.devices()[0].device_kind.lower()
        # v6e (Trillium) / v7x have 2x256^2 MXUs; v5e has 4x128^2.
        wide_mxu = any(t in kind for t in ("v6", "v7", "trillium"))
    except Exception:
        pass
    lane_cap = 256 if wide_mxu else 128
    # v7x (64 MiB VMEM) gets a tighter per-step weight-tile cap.
    max_weight_bytes = (4 << 20) if vmem_phys <= (64 << 20) else (8 << 20)
    vmem_cap = (vmem_phys * 3) // 4          # never request the whole chip
    return lane_cap, lane_cap, max_weight_bytes, vmem_cap


def _pick_group_pack(o, K, E, itemsize, lane_cap, gk_cap, max_weight_bytes):
    """Pick G groups to pack per step (block-diagonal weight) so the output lane
    width G*E approaches the MXU width, without blowing up the contraction dim
    (GK cap) or the per-step weight tile (byte cap).  Prefer lane-dense G*E."""
    if E >= lane_cap or o == 1:
        return 1
    cap = max(1, lane_cap // E)
    valid = [g for g in range(2, min(o, cap) + 1)
             if o % g == 0
             and g * K <= gk_cap
             and (g * K) * (g * E) * itemsize <= max_weight_bytes]
    if not valid:
        return 1
    dense = [g for g in valid if (g * E) % 128 == 0]
    return max(dense) if dense else max(valid)


def patch_embedding_3d_normal(x, weight, bias, patch_size, embed_dim,
                              compute_dtype=None, out_dtype=None,
                              tile_m=4096, group_pack=None):
    """x: [B, C, H, W]; weight: [o*E, c, P, Q] (PyTorch grouped-conv layout);
    bias: [o*E]. Returns [B, o, h, w, E]."""
    c, P, Q = patch_size
    B, C, H, W = x.shape
    assert C % c == 0 and H % P == 0 and W % Q == 0
    o, h, w = C // c, H // P, W // Q
    E = embed_dim
    K = c * P * Q

    cdt = jnp.dtype(compute_dtype) if compute_dtype is not None else jnp.dtype(x.dtype)
    odt = jnp.dtype(out_dtype) if out_dtype is not None else jnp.dtype(x.dtype)

    lane_cap, gk_cap, max_w_bytes, vmem_cap = _hw_params()
    if group_pack is None:
        G = _pick_group_pack(o, K, E, cdt.itemsize, lane_cap, gk_cap, max_w_bytes)
    else:
        assert o % group_pack == 0
        G = group_pack
    n_sg = o // G                        # super-groups (outer grid axis)
    GK, GE = G * K, G * E
    M = B * h * w                        # collapsed matmul M dimension

    # ---- glue: patch extraction + group packing in one relayout -------------
    # Cast to the compute dtype FIRST so this full-HBM pass moves cdt bytes.
    # TODO(synk): the (c,P,Q) patch gather is not a rectangular BlockSpec per M
    # tile; doing it in-kernel (grid over (sg, b, h-row) + VMEM rearrangement)
    # would remove this extra HBM pass but risks Mosaic transpose lowering
    # limits, so it stays in XLA (verify it fuses into one copy in HLO).
    xc = x.astype(cdt)
    xp = xc.reshape(B, n_sg, G, c, h, P, w, Q)
    xp = jnp.transpose(xp, (1, 0, 4, 6, 2, 3, 5, 7))   # [n_sg, B, h, w, G, c, P, Q]
    patches = xp.reshape(n_sg, M, GK)

    # conv weight [o*E, c, P, Q] (group-major out channels) -> per-group [K, E]
    wmat = weight.astype(cdt).reshape(o, E, K).transpose(0, 2, 1)   # [o, K, E]
    wg = wmat.reshape(n_sg, G, K, E)
    eye = jnp.eye(G, dtype=cdt)
    wbd = jnp.einsum('sgke,gf->sgkfe', wg, eye).reshape(n_sg, GK, GE)

    bmat = bias.reshape(n_sg, 1, GE).astype(jnp.float32)

    # ---- tiling --------------------------------------------------------------
    tile_m = max(8, (int(tile_m) // 8) * 8)
    TM = M if M <= tile_m else tile_m    # full dim, or a multiple-of-8 tile
    n_m = pl.cdiv(M, TM)
    # Single super-group: split M into >=2 tiles so both v7x TensorCores get work.
    if n_sg == 1 and n_m == 1 and M >= 16:
        TM = (((M + 1) // 2) + 7) // 8 * 8
        n_m = pl.cdiv(M, TM)

    patches_spec = pl.BlockSpec((1, TM, GK), lambda s, m: (s, m, 0))
    n_patch_bufs = 2
    if n_m >= 4:
        # deeper buffering on the streamed operand (hides DMA when streaming M)
        n_patch_bufs = 3
        patches_spec = pl.BlockSpec((1, TM, GK), lambda s, m: (s, m, 0),
                                    pipeline_mode=pl.Buffered(3))

    # Scoped VMEM sized from real buffer counts + headroom, capped per-generation.
    est = (n_patch_bufs * TM * GK * cdt.itemsize
           + 2 * GK * GE * cdt.itemsize
           + 2 * GE * 4
           + 2 * TM * GE * odt.itemsize)
    vmem_limit = int(min(vmem_cap, max(32 << 20, int(est * 1.25) + (1 << 20))))

    out = pl.pallas_call(
        _patch_embed_kernel,
        out_shape=jax.ShapeDtypeStruct((n_sg, M, GE), odt),
        grid_spec=pltpu.PrefetchScalarGridSpec(
            num_scalar_prefetch=0,
            grid=(n_sg, n_m),            # super-groups OUTER -> weight stays resident
            in_specs=[
                patches_spec,
                pl.BlockSpec((1, GK, GE), lambda s, m: (s, 0, 0)),
                pl.BlockSpec((1, 1, GE), lambda s, m: (s, 0, 0)),
            ],
            out_specs=pl.BlockSpec((1, TM, GE), lambda s, m: (s, m, 0)),
        ),
        compiler_params=pltpu.CompilerParams(
            dimension_semantics=("parallel", "parallel"),
            vmem_limit_bytes=vmem_limit),
    )(patches, wbd, bmat)

    # [n_sg, B*h*w, G*E] -> [B, o, h, w, E]
    # TODO(synk): when G > 1 and E < 128 this XLA un-pack moves only E-sized
    # contiguous chunks; consumers that can accept the packed (n_sg, M, G*E)
    # layout should skip it.
    out = out.reshape(n_sg, B, h, w, G, E)
    out = jnp.transpose(out, (1, 0, 4, 2, 3, 5)).reshape(B, o, h, w, E)
    return out


def init_params(key, patch_size, embed_dim, input_original_shape):
    """Deterministic trunc_normal(std=0.02, clamp [-2,2]) weights, zero bias."""
    c, P, Q = patch_size
    C = input_original_shape[0]
    o = C // c
    wt = jax.random.normal(key, (o * embed_dim, c, P, Q), jnp.float32) * 0.02
    wt = jnp.clip(wt, -2.0, 2.0)
    b = jnp.zeros((o * embed_dim,), jnp.float32)
    return wt, b


def _ref_forward(x, weight, bias, patch_size, embed_dim):
    """Plain-JAX reference with the same grouped patch-matmul semantics."""
    c, P, Q = patch_size
    B, C, H, W = x.shape
    o, h, w = C // c, H // P, W // Q
    xp = x.reshape(B, o, c, h, P, w, Q).transpose(0, 1, 3, 5, 2, 4, 6)
    pat = xp.reshape(B, o, h * w, c * P * Q)
    wm = weight.reshape(o, embed_dim, c * P * Q)
    ref = jnp.einsum("bgnk,gek->bgne", pat, wm) + bias.reshape(o, 1, embed_dim)
    return ref.reshape(B, o, h, w, embed_dim)


# TODO(synk): act='inverse' path (Linear + un-patchify) not implemented; only
# the default 'normal' patch-embedding path is covered here.


if __name__ == "__main__":
    patch_size = (2, 4, 4)              # (c, P, Q)
    embed_dim = 32
    input_original_shape = (4, 16, 16)  # (C, H, W)
    B = 2

    key = jax.random.PRNGKey(0)
    kx, kw = jax.random.split(key)
    x = jax.random.normal(kx, (B,) + input_original_shape, jnp.float32)
    weight, bias = init_params(kw, patch_size, embed_dim, input_original_shape)
    ref = _ref_forward(x, weight, bias, patch_size, embed_dim)

    # 1) default path (f32 compute/output; generation-aware group packing,
    #    M split so >=2 grid steps feed both v7x cores).
    out = jax.block_until_ready(
        patch_embedding_3d_normal(x, weight, bias, patch_size, embed_dim))
    assert out.shape == ref.shape
    assert jnp.allclose(out, ref, atol=1e-5, rtol=1e-5)

    # 2) multi-super-group (group_pack=1 -> n_sg=o=2) + partial last M tile
    #    (M=32, TM=24).
    out2 = jax.block_until_ready(
        patch_embedding_3d_normal(x, weight, bias, patch_size, embed_dim,
                                  tile_m=24, group_pack=1))
    assert jnp.allclose(out2, ref, atol=1e-5, rtol=1e-5)

    # 3) many M tiles (tile_m=8 -> n_m=4) exercises the Buffered(3) input path.
    out3 = jax.block_until_ready(
        patch_embedding_3d_normal(x, weight, bias, patch_size, embed_dim,
                                  tile_m=8))
    assert jnp.allclose(out3, ref, atol=1e-5, rtol=1e-5)

    # 4) bf16 compute + bf16 output (valid on v5e/v6e/v7x; f32 MXU accumulate
    #    and f32 bias add inside the kernel).
    out4 = jax.block_until_ready(
        patch_embedding_3d_normal(x, weight, bias, patch_size, embed_dim,
                                  compute_dtype=jnp.bfloat16,
                                  out_dtype=jnp.bfloat16))
    assert jnp.allclose(out4.astype(jnp.float32), ref, atol=3e-2, rtol=3e-2)

    print("KERNEL_OK")
</pallas_src>

<mosaic_0001>
module attributes {stable_mosaic.version = 11 : i64} {
  func.func @_patch_embed_kernel(%arg0: i32, %arg1: i32, %arg2: memref<1x16x64xf32, #tpu.memory_space<vmem>>, %arg3: memref<1x64x64xf32, #tpu.memory_space<vmem>>, %arg4: memref<1x1x64xf32, #tpu.memory_space<vmem>>, %arg5: memref<1x16x64xf32, #tpu.memory_space<vmem>>) attributes {dimension_semantics = [#tpu.dimension_semantics<parallel>, #tpu.dimension_semantics<parallel>], iteration_bounds = array<i64: 1, 2>, scalar_prefetch = 0 : i64, scratch_operands = 0 : i64, tpu.core_type = #tpu.core_type<tc>, window_params = [{transform_indices = @transform_0, window_bounds = array<i64: 1, 16, 64>}, {transform_indices = @transform_1, window_bounds = array<i64: 1, 64, 64>}, {transform_indices = @transform_2, window_bounds = array<i64: 1, 1, 64>}, {transform_indices = @transform_3, window_bounds = array<i64: 1, 16, 64>}]} {
    %c0 = arith.constant 0 : index
    %c0_0 = arith.constant 0 : index
    %c0_1 = arith.constant 0 : index
    %0 = vector.load %arg2[%c0, %c0_0, %c0_1] : memref<1x16x64xf32, #tpu.memory_space<vmem>>, vector<1x16x64xf32>
    %1 = vector.shape_cast %0 : vector<1x16x64xf32> to vector<16x64xf32>
    %c0_2 = arith.constant 0 : index
    %c0_3 = arith.constant 0 : index
    %c0_4 = arith.constant 0 : index
    %2 = vector.load %arg3[%c0_2, %c0_3, %c0_4] : memref<1x64x64xf32, #tpu.memory_space<vmem>>, vector<1x64x64xf32>
    %3 = vector.shape_cast %2 : vector<1x64x64xf32> to vector<64x64xf32>
    %cst = arith.constant dense<0.000000e+00> : vector<16x64xf32>
    %4 = tpu.matmul %1, %3, %cst {dimension_numbers = #tpu.dot_dimension_numbers<[1], [0], [0], [1], [0, 0, 1, 1], [], []>} : vector<16x64xf32>, vector<64x64xf32>, vector<16x64xf32> -> vector<16x64xf32>
    %c0_5 = arith.constant 0 : index
    %c0_6 = arith.constant 0 : index
    %c0_7 = arith.constant 0 : index
    %5 = vector.load %arg4[%c0_5, %c0_6, %c0_7] : memref<1x1x64xf32, #tpu.memory_space<vmem>>, vector<1x1x64xf32>
    %6 = vector.shape_cast %5 : vector<1x1x64xf32> to vector<1x64xf32>
    %7 = vector.broadcast %6 : vector<1x64xf32> to vector<16x64xf32>
    %8 = arith.addf %4, %7 : vector<16x64xf32>
    %c0_8 = arith.constant 0 : index
    %c0_9 = arith.constant 0 : index
    %c0_10 = arith.constant 0 : index
    %9 = vector.load %arg5[%c0_8, %c0_9, %c0_10] : memref<1x16x64xf32, #tpu.memory_space<vmem>>, vector<1x16x64xf32>
    %10 = vector.shape_cast %9 : vector<1x16x64xf32> to vector<16x64xf32>
    %11 = vector.shape_cast %8 : vector<16x64xf32> to vector<1x16x64xf32>
    tpu.vector_store %arg5[%c0_8, %c0_9, %c0_10], %11 {strides = array<i32>} : memref<1x16x64xf32, #tpu.memory_space<vmem>>, vector<1x16x64xf32>,
    return
  }
  func.func @transform_0(%arg0: i32, %arg1: i32) -> (i32, i32, i32) {
    %c0_i32 = arith.constant 0 : i32
    %c0_i32_0 = arith.constant 0 : i32
    return %arg0, %arg1, %c0_i32 : i32, i32, i32
  }
  func.func @transform_1(%arg0: i32, %arg1: i32) -> (i32, i32, i32) {
    %c0_i32 = arith.constant 0 : i32
    %c0_i32_0 = arith.constant 0 : i32
    %c0_i32_1 = arith.constant 0 : i32
    return %arg0, %c0_i32, %c0_i32_0 : i32, i32, i32
  }
  func.func @transform_2(%arg0: i32, %arg1: i32) -> (i32, i32, i32) {
    %c0_i32 = arith.constant 0 : i32
    %c0_i32_0 = arith.constant 0 : i32
    %c0_i32_1 = arith.constant 0 : i32
    return %arg0, %c0_i32, %c0_i32_0 : i32, i32, i32
  }
  func.func @transform_3(%arg0: i32, %arg1: i32) -> (i32, i32, i32) {
    %c0_i32 = arith.constant 0 : i32
    %c0_i32_0 = arith.constant 0 : i32
    return %arg0, %arg1, %c0_i32 : i32, i32, i32
  }
}

</mosaic_0001>

<bundles_post_ra>
// kernel: tpu_custom_call.1
= control target key start
LH: loop header
LB: loop body
LE: loop exit
PB: predicated region body
PF: predicated region fallthrough
CT: control target
= control target key end

     0   :  { %s872_s0 = inlined_call_operand.hbm [shape: f32[1,32,64], index: 0, kind: input, shape index: {}]   ;;  %s873_s1 = inlined_call_operand.hbm [shape: f32[1,64,64], index: 1, kind: input, shape index: {}]   ;;  %s874_s2 = inlined_call_operand.vmem [shape: f32[1,1,64], index: 2, kind: input, shape index: {}]   ;;  %s875_s3 = inlined_call_operand.hbm [shape: f32[1,32,64], index: 3, kind: output, shape index: {}]  }
   0x1   :  { %877 = sst [smem:[#allocation11_spill]] %s873_s1 }
   0x2   :  { %8 = vsyncpa [#allocation3], 0 }
   0x3   :  { %10 = vsyncpa [#allocation3 + $0x1], 0 }
   0x4   :  { %11 = vsyncpa [#allocation6], 0 }
   0x5   :  { %12 = vsyncpa [#allocation4], 0 }
   0x6   :  { %14 = vsyncpa [#allocation4 + $0x1], 0  ;;  %s706_s12 = smov 0   ;;  %s708_s13 = smov 0  }
   0x7   :  { %s710_s14 = smov 0   ;;  %s712_s15 = smov 0  }
   0x8   :  { %s714_s16 = smov 0   ;;  %s716_s17 = smov 0  }
   0x9 LB: > { %s425_s18 = sadd.s32 4294967295, %s679_s17   ;;  %s426_s19 = sadd.s32 4294967294, %s679_s17   ;;  %s679_s17 = sphi %s716_s17, %s20_s17   ;;  %s675_s16 = sphi %s714_s16, %s891_s16   ;;  %s671_s15 = sphi %s712_s15, %s890_s15   ;;  %s667_s14 = sphi %s710_s14, %s889_s14   ;;  %s663_s13 = sphi %s708_s13, %s888_s13   ;;  %s659_s12 = sphi %s706_s12, %s887_s12  }
   0xa   : > { %p54_p0 = scmp.ne.s32.totalorder %s663_s13, %s659_s12  ;;  %p740_p1 = scmp.eq.s32.totalorder %s425_s18, 0 }
   0xb   : > { %p744_p2 = scmp.eq.s32.totalorder %s425_s18, 1  ;;  %p138_p3 = scmp.eq.s32.totalorder %s426_s19, 1 }
   0xc   : > { %p750_p4 = por %p740_p1, %p54_p0  ;;  %p427_p5 = scmp.ge.s32.totalorder %s679_s17, 1 }
   0xd   : > { %p755_p6 = por %p138_p3, %p54_p0  ;;  %p145_p7 = scmp.lt.s32.totalorder %s679_s17, 3 }
   0xe   : > { %s882_s1 = sld [smem:[#allocation11_spill]]  ;;  %s681_s28 = smov [#allocation5]  }
   0xf   : > { %p763_p8 = pnand %p427_p5, %p145_p7  ;;  %s161_s29 = sshll.u32 %s681_s28, 4  ;;  %s162_s29 = int_to_ptr.vmem [resolvable:$true] %s161_s29 }
  0x10   : > { %p430_p11 = scmp.ge.s32.totalorder %s679_s17, 2  ;;  %s876_s30 = smov 128  }
  0x11   : > { %p463_p9 = pneg %p763_p8  ;;  %s683_s4 = smov 8  }
  0x12   : > { %s29_s5 = sadd.s32 1, %s675_s16  ;;  %s41_s6 = sadd.s32 1, %s667_s14 }
  0x13   : > { %p464_p10 = pnand %p463_p9, %p740_p1  ;;  %p30_p12 = scmp.ge.s32.totalorder %s29_s5, 2 }
  0x14   : > { %s159_s26 = sshll.u32 %s882_s1, 4  ;;  %p48_p13 = scmp.ne.s32.totalorder %s667_s14, %s663_s13  ;;  %s160_s26 = int_to_ptr.hbm [resolvable:$true] %s159_s26 }
  0x15   : > { %466 = dma.hbm_to_vmem [thread:$0]  (!%p464_p10), %s160_s26, 1024, %s162_s29, [#allocation6], %s876_s30, %s876_s30, %s683_s4  }
  0x16   : > { %p49_p0 = scmp.eq.s32.totalorder %s679_s17, 0  ;;  %s893_s5 = smov (%p30_p12, %s29_s5), 0 }
  0x17   : > { %p788_p5 = por %p744_p2, %p48_p13  ;;  %s37_s9 = ssub.s32 %s675_s16, %s893_s5 }
  0x18   : > { %p782_p3 = por %p49_p0, %p48_p13  ;;  %p476_p7 = scmp.lt.s32.totalorder %s679_s17, 2 }
  0x19   : > { %p39_p9 = scmp.eq.s32.totalorder %s37_s9, 0  ;;  %s181_s10 = sand.u32 1, %s667_s14  }
  0x1a   : > { %s431_s11 = sshll.u32 %s181_s10, 4  ;;  %s445_s19 = sshll.u32 %s675_s16, 4 }
  0x1b   : > { %s797_s18 = scalar_select %p39_p9, %s667_s14, %s41_s6  }
  0x1c   : > { %s192_s26 = scalar_lea.hbm %s872_s0, %s445_s19  ;;  %s185_s28 = scalar_lea.vmem [#allocation2], %s431_s11 }
  0x1d   : > { %s195_s29 = sshll.u32 %s185_s28, 4  ;;  %s193_s21 = sshll.u32 %s192_s26, 4  ;;  %s196_s29 = int_to_ptr.vmem [resolvable:$true] %s195_s29  ;;  %s194_s21 = int_to_ptr.hbm [resolvable:$true] %s193_s21 }
  0x1e   : > { %p468_p2 = pnand %p476_p7, %p782_p3  ;;  %s182_s30 = scalar_lea.sflag [#allocation3], %s181_s10 }
  0x1f   : > { %s886_s1 = smov 128   ;;  %207 = sbr.rel (%p763_p8) target bundleno = 188 (0xbc), region = 32 }
  0x20   : > { %470 = dma.hbm_to_vmem [thread:$0]  (!%p468_p2), %s194_s21, 256, %s196_s29, %s182_s30, %s886_s1, %s886_s1, %s683_s4  }
  0x21   : > { %s811_s6 = sand.u32 (!%p763_p8), 1, %s663_s13  }
  0x22   : > { %s435_s9 = sshll.u32 (!%p763_p8), %s811_s6, 4  ;;  %s210_s11 = scalar_lea.sflag (!%p763_p8), [#allocation3], %s811_s6 }
  0x23   : > { %s213_s7 = scalar_lea.vmem (!%p763_p8), [#allocation2], %s435_s9 }
  0x24   : > { %646 = dma.done.wait (%p750_p4), %s210_s11, 256  }
  0x25   : > { %648 = vsyncadd (%p750_p4), %s210_s11, 4294967040 }
  0x26   : > { %650 = dma.done.wait (%p740_p1), [#allocation6], 1024  }
  0x27   : > { %652 = vsyncadd (%p740_p1), [#allocation6], 4294966272  ;;  %v259_v0 = vld [vmem:[#allocation5 + $0x38] sm:$0xff]  ;;  %v258_v1 = vld [vmem:[#allocation5 + $0x30] sm:$0xff]  ;;  %vm264_vm0 = vcmask 523264   ;;  %s446_s1 = sshll.u32 %s671_s15, 4 }
  0x28   : > { %279 = vmatpush.msra.mxu0 %v259_v0  ;;  %447 = vmatpush.msra.mxu1 %v259_v0  ;;  %v257_v2 = vld [vmem:[#allocation5 + $0x28] sm:$0xff]  ;;  %v256_v3 = vld [vmem:[#allocation5 + $0x20] sm:$0xff]  ;;  %v255_v4 = vld [vmem:[#allocation5 + $0x18] sm:$0xff]  ;;  %s310_s27 = scalar_lea.hbm %s875_s3, %s446_s1  ;;  %s244_s10 = scalar_lea.vmem [#allocation7], %s435_s9 }
  0x29   : > { %v254_v5 = vld [vmem:[#allocation5 + $0x10] sm:$0xff]  ;;  %v253_v6 = vld [vmem:[#allocation5 + $0x8] sm:$0xff]  ;;  %v252_v7 = vld [vmem:[#allocation5] sm:$0xff]  ;;  %s311_s19 = sshll.u32 %s244_s10, 4  ;;  %s313_s24 = sshll.u32 %s310_s27, 4  ;;  %s312_s19 = int_to_ptr.vmem [resolvable:$true] %s311_s19  ;;  %s314_s24 = int_to_ptr.hbm [resolvable:$true] %s313_s24 }
  0x2a   : > { %280 = vmatpush.msra.mxu0 %v258_v1  ;;  %448 = vmatpush.msra.mxu1 %v258_v1  ;;  %v250_v8 = vld [vmem:[%s213_s7] sm:$0xff]  ;;  %v251_v9 = vld [vmem:[%s213_s7 + $0x8] sm:$0xff]  ;;  %s297_s15 = scalar_lea.sflag [#allocation4], %s811_s6  ;;  %s607_s25 = sshra.s32 %s314_s24, 4  ;;  %s608_s25 = int_to_ptr.hbm [resolvable:$true] %s607_s25 }
  0x2b   : > { %v532_v10 = vld [vmem:[%s874_s2] ss:$0 sm:$0xff]  ;;  %s609_s26 = scalar_lea.hbm %s608_s25, 16  ;;  %s613_s21 = scalar_lea.hbm %s875_s3, 32 }
  0x2c   : > { %281 = vmatpush.msra.mxu0 %v257_v2  ;;  %449 = vmatpush.msra.mxu1 %v257_v2  ;;  %p610_p1 = scmp.ne.s32.totalorder %s608_s25, %s609_s26  ;;  %p614_p10 = scmp.lt.s32.totalorder %s608_s25, %s875_s3 }
  0x2d   : > { %p615_p12 = scmp.lt.s32.totalorder %s613_s21, %s609_s26 }
  0x2e   : > { %282 = vmatpush.msra.mxu0 %v256_v3  ;;  %450 = vmatpush.msra.mxu1 %v256_v3  ;;  %p611_p4 = pnand %p610_p1, %p788_p5 }
  0x2f   : > { %p616_p13 = por %p615_p12, %p614_p10 }
  0x30   : > { %283 = vmatpush.msra.mxu0 %v255_v4  ;;  %451 = vmatpush.msra.mxu1 %v255_v4  ;;  %p612_p8 = pneg %p611_p4 }
  0x32   : > { %284 = vmatpush.msra.mxu0 %v254_v5  ;;  %452 = vmatpush.msra.mxu1 %v254_v5  ;;  %p617_p0 = pnand %p616_p13, %p612_p8 }
  0x34   : > { %285 = vmatpush.msra.mxu0 %v253_v6  ;;  %453 = vmatpush.msra.mxu1 %v253_v6 }
  0x36   : > { %286 = vmatpush.msra.mxu0 %v252_v7  ;;  %454 = vmatpush.msra.mxu1 %v252_v7 }
  0x37   : > { %438 = vmatmul.msk.f32.vlgmr.msra.gmra.mxu0 %vm264_vm0, %v250_v8  ;;  %439 = vmatmul.msk.f32.vlgmr.msra.gmra.mxu1 %vm264_vm0, %v251_v9 }
  0xb4   : > { %v288_v11 = vpop.f32.mrf.mxu0  ;;  %v291_v12 = vpop.f32.mrf.mxu1 }
  0xb5   : > { %v289_v13 = vadd.f32 %v532_v10, %v288_v11  ;;  %v292_v14 = vadd.f32 %v532_v10, %v291_v12 }
  0xb7   : > { %294 = vst.msk [vmem:[%s244_s10] sm:$0xff] %vm264_vm0, %v289_v13 }
  0xb8   : > { %295 = vst.msk [vmem:[%s244_s10 + $0x8] sm:$0xff] %vm264_vm0, %v292_v14 }
  0xb9   : > { %620 = shalt.err (!%p617_p0)
}
  0xba   : > { %s684_s6 = smov 128   ;;  %s685_s7 = smov 8  }
  0xbb   : > { %461 = dma.vmem_to_hbm [thread:$0]  (%p788_p5), %s312_s19, 256, %s314_s24, %s297_s15, %s684_s6, %s684_s6, %s685_s7  }
  0xbc PF: > { %s328_s1 = sand.u32 1, %s659_s12   ;;  %p472_p3 = pnand %p430_p11, %p755_p6 }
  0xbd   : > { %s329_s20 = scalar_lea.sflag [#allocation4], %s328_s1 }
  0xbe   : > { %p473_p7 = pneg %p472_p3 }
  0xc0   : > { %654 = dma.done.wait (%p473_p7), %s329_s20, 256  }
  0xc1   : > { %656 = vsyncadd (%p473_p7), %s329_s20, 4294967040  ;;  %s20_s17 = sadd.s32 1, %s679_s17   ;;  %s887_s12 = smov %s663_s13 }
  0xc2   : > { %p17_p9 = scmp.ge.s32.totalorder %s20_s17, 4   ;;  %s888_s13 = smov %s667_s14 }
  0xc3   : > { %s889_s14 = smov %s797_s18  ;;  %s890_s15 = smov %s675_s16 }
  0xc4   : > { %s891_s16 = smov %s893_s5  ;;  %19 = sbr.rel (!%p17_p9) target bundleno = 9 (0x9), region = 85 }
  0xc9   :  { %335 = vsyncpa [#allocation3], 1 }
  0xca   :  { %337 = vsyncpa [#allocation3 + $0x1], 1 }
  0xcb   :  { %338 = vsyncpa [#allocation6], 1 }
  0xcc   :  { %339 = vsyncpa [#allocation4], 1 }
  0xcd   :  { %341 = vsyncpa [#allocation4 + $0x1], 1 }

</bundles_post_ra>
